<compile_context>
chip_gen: v7x
topology: tpu7x:2x2x1
jax: 0.10.0
libtpu: 0.0.40
codegen_flags: <defaults>
</compile_context>

<pallas_src>
import functools

import jax
import jax.numpy as jnp
from jax.experimental import pallas as pl
from jax.experimental.pallas import tpu as pltpu


def _round_up(x: int, m: int) -> int:
    return (x + m - 1) // m * m


def _patch_embed_kernel(x_ref, w_ref, b_ref, o_ref):
    # x_ref: (tm, K_pad) bf16, w_ref: (K_pad, E_pad) bf16,
    # b_ref: (1, E_pad) f32,  o_ref: (tm, E_pad) f32.
    acc = jnp.dot(x_ref[...], w_ref[...], preferred_element_type=jnp.float32)
    o_ref[...] = (acc + b_ref[...]).astype(o_ref.dtype)


@functools.partial(jax.jit, static_argnames=("patch_size",))
def patch_embedding_forward(x, weight, bias, patch_size):
    """x: (B, C, H, W) NCHW float32.
    weight: (E, C, P, P) as in nn.Conv2d. bias: (E,).
    Returns (B, n_patches, E) matching PyTorch PatchEmbedding.forward.
    """
    B, C, H, W = x.shape
    P = patch_size
    assert H == W and H % P == 0
    nH = H // P
    n_patches = nH * nH
    E = weight.shape[0]
    K = C * P * P
    M = B * n_patches

    # Patchify: (B, C, nH, P, nW, P) -> (B, nH, nW, C, P, P) -> (M, K).
    # Done in plain JAX under jit so the transpose fuses with the bf16 cast and
    # padding below (the intermediate slab is written/read once in bf16).
    # TODO(synk): fully fusing patch extraction into the pallas_call (BlockSpec
    # windows over the NCHW input) would remove this intermediate entirely.
    patches = x.reshape(B, C, nH, P, nH, P).transpose(0, 2, 4, 1, 3, 5)
    patches = patches.reshape(M, K).astype(jnp.bfloat16)

    # Conv weight (E, C, P, P) -> matmul weight (K, E); bf16 for the MXU.
    # Bias stays f32 so the epilogue add is f32 (v5e has no bf16 VALU).
    w_mat = weight.reshape(E, K).T.astype(jnp.bfloat16)
    b_mat = bias.reshape(1, E).astype(jnp.float32)

    # Pad K/E to the 128-lane width (lane-dense loads, full-width MXU feed,
    # unmasked output stores) and M to the row tile.
    K_pad = _round_up(max(K, 128), 128)
    E_pad = _round_up(max(E, 128), 128)
    tm = min(512, _round_up(M, 8))          # multiple of 256 once M is large
    M_pad = _round_up(M, tm)

    patches = jnp.pad(patches, ((0, M_pad - M), (0, K_pad - K)))
    w_mat = jnp.pad(w_mat, ((0, K_pad - K), (0, E_pad - E)))
    b_mat = jnp.pad(b_mat, ((0, 0), (0, E_pad - E)))

    out = pl.pallas_call(
        _patch_embed_kernel,
        out_shape=jax.ShapeDtypeStruct((M_pad, E_pad), jnp.float32),
        grid_spec=pltpu.PrefetchScalarGridSpec(
            num_scalar_prefetch=0,
            grid=(M_pad // tm,),
            in_specs=[
                pl.BlockSpec((tm, K_pad), lambda i: (i, 0)),
                pl.BlockSpec((K_pad, E_pad), lambda i: (0, 0)),  # constant -> resident
                pl.BlockSpec((1, E_pad), lambda i: (0, 0)),
            ],
            out_specs=pl.BlockSpec((tm, E_pad), lambda i: (i, 0)),
        ),
        compiler_params=pltpu.CompilerParams(
            dimension_semantics=("parallel",),
            vmem_limit_bytes=64 * 1024 * 1024,
        ),
    )(patches, w_mat, b_mat)

    out = out[:M, :E].astype(x.dtype)
    return out.reshape(B, n_patches, E)


def init_patch_embedding_params(key, in_channels, embed_dim, patch_size):
    """Deterministic xavier_uniform_ init for conv weight, zeros for bias
    (matches the module's _init_weights)."""
    P = patch_size
    fan_in = in_channels * P * P
    fan_out = embed_dim * P * P
    bound = (6.0 / (fan_in + fan_out)) ** 0.5
    weight = jax.random.uniform(
        key, (embed_dim, in_channels, P, P),
        minval=-bound, maxval=bound, dtype=jnp.float32)
    bias = jnp.zeros((embed_dim,), dtype=jnp.float32)
    return weight, bias


if __name__ == "__main__":
    # Small shapes consistent with the module: img_size=16, patch_size=4,
    # in_channels=4, embed_dim=32, batch=2 -> n_patches = (16//4)**2 = 16.
    B, C, IMG, P, E = 2, 4, 16, 4, 32

    key = jax.random.PRNGKey(0)
    kx, kw = jax.random.split(key)
    x = jax.random.normal(kx, (B, C, IMG, IMG), dtype=jnp.float32)
    weight, bias = init_patch_embedding_params(kw, C, E, P)

    out = patch_embedding_forward(x, weight, bias, P)
    out = jax.block_until_ready(out)

    # Reference check: same bf16-input / f32-accumulate numerics as the kernel.
    nH = IMG // P
    patches_ref = x.reshape(B, C, nH, P, nH, P).transpose(0, 2, 4, 1, 3, 5)
    patches_ref = patches_ref.reshape(B, nH * nH, C * P * P)
    patches_ref = patches_ref.astype(jnp.bfloat16).astype(jnp.float32)
    w_ref = weight.reshape(E, -1).T.astype(jnp.bfloat16).astype(jnp.float32)
    ref = patches_ref @ w_ref + bias

    assert out.shape == (B, (IMG // P) ** 2, E)
    assert jnp.allclose(out, ref, atol=1e-3, rtol=1e-3)

    print("KERNEL_OK")
</pallas_src>

<mosaic_0001>
module attributes {stable_mosaic.version = 11 : i64} {
  func.func @_patch_embed_kernel(%arg0: i32, %arg1: memref<32x128xbf16, #tpu.memory_space<vmem>>, %arg2: memref<128x128xbf16, #tpu.memory_space<vmem>>, %arg3: memref<1x128xf32, #tpu.memory_space<vmem>>, %arg4: memref<32x128xf32, #tpu.memory_space<vmem>>) attributes {dimension_semantics = [#tpu.dimension_semantics<parallel>], iteration_bounds = array<i64: 1>, scalar_prefetch = 0 : i64, scratch_operands = 0 : i64, tpu.core_type = #tpu.core_type<tc>, window_params = [{transform_indices = @transform_0, window_bounds = array<i64: 32, 128>}, {pipeline_mode = #tpu.pipeline_mode<synchronous>, transform_indices = @transform_1, window_bounds = array<i64: 128, 128>}, {pipeline_mode = #tpu.pipeline_mode<synchronous>, transform_indices = @transform_2, window_bounds = array<i64: 1, 128>}, {transform_indices = @transform_3, window_bounds = array<i64: 32, 128>}]} {
    %c0 = arith.constant 0 : index
    %c0_0 = arith.constant 0 : index
    %0 = vector.load %arg1[%c0, %c0_0] : memref<32x128xbf16, #tpu.memory_space<vmem>>, vector<32x128xbf16>
    %c0_1 = arith.constant 0 : index
    %c0_2 = arith.constant 0 : index
    %1 = vector.load %arg2[%c0_1, %c0_2] : memref<128x128xbf16, #tpu.memory_space<vmem>>, vector<128x128xbf16>
    %cst = arith.constant dense<0.000000e+00> : vector<32x128xf32>
    %2 = tpu.matmul %0, %1, %cst {dimension_numbers = #tpu.dot_dimension_numbers<[1], [0], [0], [1], [0, 0, 1, 1], [], []>} : vector<32x128xbf16>, vector<128x128xbf16>, vector<32x128xf32> -> vector<32x128xf32>
    %c0_3 = arith.constant 0 : index
    %c0_4 = arith.constant 0 : index
    %3 = vector.load %arg3[%c0_3, %c0_4] : memref<1x128xf32, #tpu.memory_space<vmem>>, vector<1x128xf32>
    %4 = vector.broadcast %3 : vector<1x128xf32> to vector<32x128xf32>
    %5 = arith.addf %2, %4 : vector<32x128xf32>
    %c0_5 = arith.constant 0 : index
    %c0_6 = arith.constant 0 : index
    %6 = vector.load %arg4[%c0_5, %c0_6] : memref<32x128xf32, #tpu.memory_space<vmem>>, vector<32x128xf32>
    tpu.vector_store %arg4[%c0_5, %c0_6], %5 {strides = array<i32>} : memref<32x128xf32, #tpu.memory_space<vmem>>, vector<32x128xf32>,
    return
  }
  func.func @transform_0(%arg0: i32) -> (i32, i32) {
    %c0_i32 = arith.constant 0 : i32
    %c0_i32_0 = arith.constant 0 : i32
    return %arg0, %c0_i32 : i32, i32
  }
  func.func @transform_1(%arg0: i32) -> (i32, i32) {
    %c0_i32 = arith.constant 0 : i32
    %c0_i32_0 = arith.constant 0 : i32
    %c0_i32_1 = arith.constant 0 : i32
    return %c0_i32, %c0_i32_0 : i32, i32
  }
  func.func @transform_2(%arg0: i32) -> (i32, i32) {
    %c0_i32 = arith.constant 0 : i32
    %c0_i32_0 = arith.constant 0 : i32
    %c0_i32_1 = arith.constant 0 : i32
    return %c0_i32, %c0_i32_0 : i32, i32
  }
  func.func @transform_3(%arg0: i32) -> (i32, i32) {
    %c0_i32 = arith.constant 0 : i32
    %c0_i32_0 = arith.constant 0 : i32
    return %arg0, %c0_i32 : i32, i32
  }
}

</mosaic_0001>

<bundles_post_ra>
// kernel: patch_embedding_forward.1
= control target key start
LH: loop header
LB: loop body
LE: loop exit
PB: predicated region body
PF: predicated region fallthrough
CT: control target
= control target key end

     0   :  { %8 = vsyncpa [#allocation3], 0  ;;  %s449_s0 = inlined_call_operand.hbm [shape: bf16[32,128], index: 0, kind: input, shape index: {}]   ;;  %s450_s1 = inlined_call_operand.hbm [shape: bf16[128,128], index: 1, kind: input, shape index: {}]   ;;  %s451_s2 = inlined_call_operand.hbm [shape: f32[1,128], index: 2, kind: input, shape index: {}]   ;;  %s452_s3 = inlined_call_operand.hbm [shape: f32[32,128], index: 3, kind: output, shape index: {}]  }
   0x1   :  { %9 = vsyncpa [#allocation6], 0 }
   0x2   :  { %10 = vsyncpa [#allocation4], 0  ;;  %s366_s12 = smov [#allocation5]   ;;  %s367_s14 = smov [#allocation2]  }
   0x3   :  { %s28_s13 = sshll.u32 %s366_s12, 4  ;;  %s16_s15 = sshll.u32 %s367_s14, 4  ;;  %s29_s13 = int_to_ptr.vmem [resolvable:$true] %s28_s13  ;;  %s394_s15 = int_to_ptr.vmem [resolvable:$true] %s16_s15 }
   0x4   :  { %s272_s18 = scalar_lea.hbm %s450_s1, 1024 }
   0x5   :  { %p273_p0 = scmp.ne.s32.totalorder %s450_s1, %s272_s18  ;;  %p276_p1 = scmp.lt.u32.totalorder %s272_s18, %s450_s1 }
   0x7   :  { %p278_p2 = pnand %p276_p1, %p273_p0 }
   0x9   :  { %281 = shalt.err (!%p278_p2)
}
   0xa   :  { %s282_s23 = scalar_lea.vmem %s29_s13, 1024  ;;  %p287_p4 = scmp.lt.s32.totalorder %s29_s13, %s29_s13 }
   0xb   :  { %p283_p3 = scmp.ne.s32.totalorder %s29_s13, %s282_s23  ;;  %p288_p5 = scmp.lt.s32.totalorder %s282_s23, %s282_s23 }
   0xd   :  { %p289_p6 = por %p288_p5, %p287_p4 }
   0xf   :  { %p290_p7 = pnand %p289_p6, %p283_p3 }
  0x11   :  { %293 = shalt.err (!%p290_p7)
}
  0x12   :  { %s368_s24 = smov 64   ;;  %s369_s25 = smov 4  }
  0x13   :  { %34 = dma.hbm_to_vmem [thread:$0]  %s450_s1, 1024, %s29_s13, [#allocation6], %s368_s24, %s368_s24, %s369_s25  }
  0x14   :  { %s294_s30 = scalar_lea.hbm %s449_s0, 256 }
  0x15   :  { %p295_p8 = scmp.ne.s32.totalorder %s449_s0, %s294_s30  ;;  %p298_p9 = scmp.lt.u32.totalorder %s294_s30, %s449_s0 }
  0x17   :  { %p300_p10 = pnand %p298_p9, %p295_p8 }
  0x19   :  { %303 = shalt.err (!%p300_p10)
}
  0x1a   :  { %s304_s8 = scalar_lea.vmem %s394_s15, 256  ;;  %p309_p12 = scmp.lt.s32.totalorder %s394_s15, %s394_s15 }
  0x1b   :  { %p305_p11 = scmp.ne.s32.totalorder %s394_s15, %s304_s8  ;;  %p310_p13 = scmp.lt.s32.totalorder %s304_s8, %s304_s8 }
  0x1d   :  { %p311_p0 = por %p310_p13, %p309_p12 }
  0x1f   :  { %p312_p1 = pnand %p311_p0, %p305_p11 }
  0x21   :  { %315 = shalt.err (!%p312_p1)
}
  0x22   :  { %22 = dma.hbm_to_vmem [thread:$0]  %s449_s0, 256, %s394_s15, [#allocation3], %s368_s24, %s368_s24, %s369_s25  }
  0x23   :  { %s370_s10 = smov [#allocation7]   ;;  %s316_s14 = scalar_lea.hbm %s451_s2, 16 }
  0x24   :  { %s41_s11 = sshll.u32 %s370_s10, 4  ;;  %p317_p2 = scmp.ne.s32.totalorder %s451_s2, %s316_s14  ;;  %s42_s11 = int_to_ptr.vmem [resolvable:$true] %s41_s11 }
  0x25   :  { %p320_p3 = scmp.lt.u32.totalorder %s316_s14, %s451_s2 }
  0x27   :  { %p322_p4 = pnand %p320_p3, %p317_p2 }
  0x29   :  { %325 = shalt.err (!%p322_p4)
}
  0x2a   :  { %s326_s20 = scalar_lea.vmem %s42_s11, 16  ;;  %s330_s0 = scalar_lea.vmem %s42_s11, 32 }
  0x2b   :  { %p327_p5 = scmp.ne.s32.totalorder %s42_s11, %s326_s20  ;;  %p331_p6 = scmp.lt.s32.totalorder %s42_s11, %s42_s11 }
  0x2c   :  { %p332_p7 = scmp.lt.s32.totalorder %s330_s0, %s326_s20 }
  0x2e   :  { %p333_p8 = por %p332_p7, %p331_p6 }
  0x30   :  { %p334_p9 = pnand %p333_p8, %p327_p5 }
  0x32   :  { %337 = shalt.err (!%p334_p9)
}
  0x33   :  { %44 = dma.hbm_to_vmem [thread:$0]  %s451_s2, 16, %s42_s11, [#allocation6]  }
  0x34   :  { %360 = dma.done.wait [#allocation3], 256  }
  0x35   :  { %361 = vsyncadd [#allocation3], 4294967040 }
  0x36   :  { %362 = dma.done.wait [#allocation6], 1040  }
  0x37   :  { %363 = vsyncadd [#allocation6], 4294966256  ;;  %v262_v0 = vld [vmem:[#allocation5] sm:$0xff]   ;;  %v263_v1 = vld [vmem:[#allocation5 + $0x8] sm:$0xff]   ;;  %s371_s2 = smov [#allocation8]  }
  0x38   :  { %234 = vmatprep.subr.bf16.mxu0 %v262_v0  ;;  %v264_v2 = vld [vmem:[#allocation5 + $0x10] sm:$0xff]   ;;  %v265_v3 = vld [vmem:[#allocation5 + $0x18] sm:$0xff]   ;;  %v266_v5 = vld [vmem:[#allocation5 + $0x20] sm:$0xff]   ;;  %s200_s22 = sshll.u32 %s371_s2, 4  ;;  %s201_s22 = int_to_ptr.vmem [resolvable:$true] %s200_s22 }
  0x39   :  { %235 = vmatpush3.bf16.msra.mxu0 %v262_v0  ;;  %v270_v4 = vld [vmem:[#allocation2] sm:$0xff]   ;;  %v267_v6 = vld [vmem:[#allocation5 + $0x28] sm:$0xff]   ;;  %v269_v8 = vld [vmem:[#allocation5 + $0x38] sm:$0xff]   ;;  %s338_s23 = scalar_lea.vmem %s201_s22, 512  ;;  %p343_p11 = scmp.lt.s32.totalorder %s201_s22, %s201_s22 }
  0x3a   :  { %236 = vmatprep.subr.bf16.mxu0 %v263_v1  ;;  %250 = vmatprep.mubr.bf16.mxu0 %v270_v4  ;;  %v268_v7 = vld [vmem:[#allocation5 + $0x30] sm:$0xff]   ;;  %v271_v9 = vld [vmem:[#allocation2 + $0x8] sm:$0xff]   ;;  %v213_v10 = vld [vmem:[#allocation7] ss:$0 sm:$0xff]  ;;  %p339_p10 = scmp.ne.s32.totalorder %s201_s22, %s338_s23  ;;  %p344_p12 = scmp.lt.s32.totalorder %s338_s23, %s338_s23 }
  0x3c   :  { %p345_p13 = por %p344_p12, %p343_p11 }
  0x3d   :  { %237 = vmatpush3.bf16.msra.mxu0 %v263_v1 }
  0x3e   :  { %238 = vmatprep.subr.bf16.mxu0 %v264_v2  ;;  %p346_p0 = pnand %p345_p13, %p339_p10 }
  0x41   :  { %239 = vmatpush3.bf16.msra.mxu0 %v264_v2 }
  0x42   :  { %240 = vmatprep.subr.bf16.mxu0 %v265_v3 }
  0x45   :  { %241 = vmatpush3.bf16.msra.mxu0 %v265_v3 }
  0x46   :  { %242 = vmatprep.subr.bf16.mxu0 %v266_v5 }
  0x49   :  { %243 = vmatpush3.bf16.msra.mxu0 %v266_v5 }
  0x4a   :  { %244 = vmatprep.subr.bf16.mxu0 %v267_v6 }
  0x4d   :  { %245 = vmatpush3.bf16.msra.mxu0 %v267_v6 }
  0x4e   :  { %246 = vmatprep.subr.bf16.mxu0 %v268_v7 }
  0x51   :  { %247 = vmatpush3.bf16.msra.mxu0 %v268_v7 }
  0x52   :  { %248 = vmatprep.subr.bf16.mxu0 %v269_v8 }
  0x55   :  { %249 = vmatpush3.bf16.msra.mxu0 %v269_v8 }
  0x58   :  { %251 = vmatmul.mubr.bf16.vlgmr.msra.gmra.mrb[0].mxu0 %v271_v9 }
 0x12b   :  { %v252_v11 = vpop.f32.mrb[0].mxu0 }
 0x12c   :  { %v185_v12 = vadd.f32 %v252_v11, %v213_v10  ;;  %v176_v13 = vpop.f32.mrb[1].mxu0 }
 0x12d   :  { %v177_v14 = vadd.f32 %v213_v10, %v176_v13  ;;  %v253_v15 = vpop.f32.mrb[2].mxu0 }
 0x12e   :  { %193 = vst [vmem:[#allocation8 + $0x10] sm:$0xff] %v185_v12  ;;  %v188_v16 = vadd.f32 %v253_v15, %v213_v10  ;;  %v179_v17 = vpop.f32.mrb[3].mxu0 }
 0x12f   :  { %191 = vst [vmem:[#allocation8] sm:$0xff] %v177_v14  ;;  %v180_v18 = vadd.f32 %v213_v10, %v179_v17 }
 0x130   :  { %194 = vst [vmem:[#allocation8 + $0x18] sm:$0xff] %v188_v16 }
 0x131   :  { %192 = vst [vmem:[#allocation8 + $0x8] sm:$0xff] %v180_v18 }
 0x132   :  { %349 = shalt.err (!%p346_p0)
}
 0x133   :  { %s350_s26 = scalar_lea.hbm %s452_s3, 512 }
 0x134   :  { %p351_p1 = scmp.ne.s32.totalorder %s452_s3, %s350_s26  ;;  %p354_p2 = scmp.lt.u32.totalorder %s350_s26, %s452_s3 }
 0x136   :  { %p356_p3 = pnand %p354_p2, %p351_p1 }
 0x138   :  { %359 = shalt.err (!%p356_p3)
}
 0x139   :  { %s372_s4 = smov 128   ;;  %s373_s5 = smov 8  }
 0x13a   :  { %206 = dma.vmem_to_hbm [thread:$0]  %s201_s22, 512, %s452_s3, [#allocation4], %s372_s4, %s372_s4, %s373_s5  }
 0x13b   :  { %364 = dma.done.wait [#allocation4], 512  }
 0x13c   :  { %365 = vsyncadd [#allocation4], 4294966784 }
 0x13d   :  { %210 = vsyncpa [#allocation3], 1 }
 0x13e   :  { %211 = vsyncpa [#allocation6], 1 }
 0x13f   :  { %212 = vsyncpa [#allocation4], 1 }

</bundles_post_ra>
